<compile_context>
chip_gen: v5e
topology: v5e:2x2
jax: 0.10.0
libtpu: 0.0.40
codegen_flags: <defaults>
</compile_context>

<pallas_src>
import jax
import jax.numpy as jnp
from jax.experimental import pallas as pl
from jax.experimental.pallas import tpu as pltpu


# ----------------------------------------------------------------------------
# Kernel: one row-block of flattened row-pairs -> 4 Haar subbands
#   x_ref  : (bm, 2*W)   rows are [x[n,c,2i,0:W], x[n,c,2i+1,0:W]]
#   cs_ref : (W, W/2)    column "sum"  taps  (+0.5 on lanes 2j and 2j+1)
#   cd_ref : (W, W/2)    column "diff" taps  (-0.5 on 2j, +0.5 on 2j+1)
#   o_ref  : (4, bm, W/2) subbands LL, LH, HL, HH
# ----------------------------------------------------------------------------
def _haar_kernel(x_ref, cs_ref, cd_ref, o_ref):
    x = x_ref[...]                      # (bm, 2W), read once
    W = cs_ref.shape[0]
    top = x[:, :W]                      # row 2i   (static lane slice)
    bot = x[:, W:]                      # row 2i+1 (static lane slice)
    rsum = top + bot                    # row "low-pass"
    rdif = bot - top                    # row "high-pass"
    cs = cs_ref[...]
    cd = cd_ref[...]
    # Column pair-combine via MXU (selection matrices carry the +-0.5 taps).
    o_ref[0] = jnp.dot(rsum, cs, preferred_element_type=jnp.float32)  # LL
    o_ref[1] = jnp.dot(rsum, cd, preferred_element_type=jnp.float32)  # LH
    o_ref[2] = jnp.dot(rdif, cs, preferred_element_type=jnp.float32)  # HL
    o_ref[3] = jnp.dot(rdif, cd, preferred_element_type=jnp.float32)  # HH


def harr_wav(x, *, block_rows=1024):
    """Haar analysis matching torch Harr_wav.  x: (N, C, H, W) -> (N, 4, C, H/2, W/2)."""
    N, C, H, W = x.shape
    assert H % 2 == 0 and W % 2 == 0, "H and W must be even"
    H2, W2 = H // 2, W // 2
    B2 = N * C * H2

    # Free row-major reshape: each row holds the two input rows of one output row.
    x2 = x.reshape(B2, 2 * W)

    # Row-block size for the grid (multiple of 8 when tiling; full when small).
    bm = B2 if B2 <= block_rows else block_rows
    n_blocks = pl.cdiv(B2, bm)
    B2p = n_blocks * bm
    if B2p != B2:
        x2 = jnp.pad(x2, ((0, B2p - B2), (0, 0)))

    # Constant (W, W2) column-combination matrices carrying the Haar taps.
    w_idx = jnp.arange(W)
    j_idx = jnp.arange(W2)
    pair = (w_idx[:, None] // 2) == j_idx[None, :]
    cs = jnp.where(pair, 0.5, 0.0).astype(jnp.float32)                        # +0.5, +0.5
    sign = jnp.where(w_idx[:, None] % 2 == 0, -0.5, 0.5)
    cd = jnp.where(pair, sign, 0.0).astype(jnp.float32)                       # -0.5, +0.5

    out = pl.pallas_call(
        _haar_kernel,
        out_shape=jax.ShapeDtypeStruct((4, B2p, W2), jnp.float32),
        grid_spec=pltpu.PrefetchScalarGridSpec(
            num_scalar_prefetch=0,
            grid=(n_blocks,),
            in_specs=[
                pl.BlockSpec((bm, 2 * W), lambda i: (i, 0)),
                pl.BlockSpec((W, W2), lambda i: (0, 0)),
                pl.BlockSpec((W, W2), lambda i: (0, 0)),
            ],
            out_specs=pl.BlockSpec((4, bm, W2), lambda i: (0, i, 0)),
        ),
        compiler_params=pltpu.CompilerParams(
            dimension_semantics=("parallel",),   # independent row blocks (v7x megacore)
        ),
    )(x2, cs, cd)

    if B2p != B2:
        out = out[:, :B2, :]
    # (4, N*C*H2, W2) -> (N, 4, C, H2, W2)  (matches torch conv3d output layout)
    out = out.reshape(4, N, C, H2, W2)
    return jnp.transpose(out, (1, 0, 2, 3, 4))


# ----------------------------------------------------------------------------
# Pure-JAX reference (mirrors the torch conv3d with the fixed Haar filter bank)
# ----------------------------------------------------------------------------
def _reference(x):
    a = x[:, :, 0::2, 0::2]
    b = x[:, :, 0::2, 1::2]
    c = x[:, :, 1::2, 0::2]
    d = x[:, :, 1::2, 1::2]
    ll = 0.5 * (a + b + c + d)
    lh = 0.5 * (-a + b - c + d)
    hl = 0.5 * (-a - b + c + d)
    hh = 0.5 * (a - b - c + d)
    return jnp.stack([ll, lh, hl, hh], axis=1)


if __name__ == "__main__":
    key = jax.random.PRNGKey(0)
    # NCHW input, same convention as the torch module: (N=2, C=4, H=16, W=16)
    x = jax.random.normal(key, (2, 4, 16, 16), jnp.float32)

    out = jax.jit(harr_wav)(x)
    jax.block_until_ready(out)

    assert out.shape == (2, 4, 4, 8, 8) and out.dtype == jnp.float32
    ref = _reference(x)
    assert float(jnp.max(jnp.abs(out - ref))) < 1e-2, "mismatch vs Haar reference"
    print("KERNEL_OK")
</pallas_src>

<mosaic_0001>
module attributes {stable_mosaic.version = 11 : i64} {
  func.func @_haar_kernel(%arg0: i32, %arg1: memref<64x32xf32, #tpu.memory_space<vmem>>, %arg2: memref<16x8xf32, #tpu.memory_space<vmem>>, %arg3: memref<16x8xf32, #tpu.memory_space<vmem>>, %arg4: memref<4x64x8xf32, #tpu.memory_space<vmem>>) attributes {dimension_semantics = [#tpu.dimension_semantics<parallel>], iteration_bounds = array<i64: 1>, scalar_prefetch = 0 : i64, scratch_operands = 0 : i64, tpu.core_type = #tpu.core_type<tc>, window_params = [{transform_indices = @transform_0, window_bounds = array<i64: 64, 32>}, {pipeline_mode = #tpu.pipeline_mode<synchronous>, transform_indices = @transform_1, window_bounds = array<i64: 16, 8>}, {pipeline_mode = #tpu.pipeline_mode<synchronous>, transform_indices = @transform_2, window_bounds = array<i64: 16, 8>}, {transform_indices = @transform_3, window_bounds = array<i64: 4, 64, 8>}]} {
    %c0 = arith.constant 0 : index
    %c0_0 = arith.constant 0 : index
    %0 = vector.load %arg1[%c0, %c0_0] : memref<64x32xf32, #tpu.memory_space<vmem>>, vector<64x32xf32>
    %1 = vector.extract_strided_slice %0 {offsets = [0, 0], sizes = [64, 16], strides = [1, 1]} : vector<64x32xf32> to vector<64x16xf32>
    %2 = vector.extract_strided_slice %0 {offsets = [0, 16], sizes = [64, 16], strides = [1, 1]} : vector<64x32xf32> to vector<64x16xf32>
    %3 = arith.addf %1, %2 : vector<64x16xf32>
    %4 = arith.subf %2, %1 : vector<64x16xf32>
    %c0_1 = arith.constant 0 : index
    %c0_2 = arith.constant 0 : index
    %5 = vector.load %arg2[%c0_1, %c0_2] : memref<16x8xf32, #tpu.memory_space<vmem>>, vector<16x8xf32>
    %c0_3 = arith.constant 0 : index
    %c0_4 = arith.constant 0 : index
    %6 = vector.load %arg3[%c0_3, %c0_4] : memref<16x8xf32, #tpu.memory_space<vmem>>, vector<16x8xf32>
    %cst = arith.constant dense<0.000000e+00> : vector<64x8xf32>
    %7 = tpu.matmul %3, %5, %cst {dimension_numbers = #tpu.dot_dimension_numbers<[1], [0], [0], [1], [0, 0, 1, 1], [], []>} : vector<64x16xf32>, vector<16x8xf32>, vector<64x8xf32> -> vector<64x8xf32>
    %c0_5 = arith.constant 0 : index
    %c0_6 = arith.constant 0 : index
    %c0_7 = arith.constant 0 : index
    %8 = vector.load %arg4[%c0_5, %c0_6, %c0_7] : memref<4x64x8xf32, #tpu.memory_space<vmem>>, vector<1x64x8xf32>
    %9 = vector.shape_cast %8 : vector<1x64x8xf32> to vector<64x8xf32>
    %10 = vector.shape_cast %7 : vector<64x8xf32> to vector<1x64x8xf32>
    tpu.vector_store %arg4[%c0_5, %c0_6, %c0_7], %10 {strides = array<i32>} : memref<4x64x8xf32, #tpu.memory_space<vmem>>, vector<1x64x8xf32>,
    %cst_8 = arith.constant dense<0.000000e+00> : vector<64x8xf32>
    %11 = tpu.matmul %3, %6, %cst_8 {dimension_numbers = #tpu.dot_dimension_numbers<[1], [0], [0], [1], [0, 0, 1, 1], [], []>} : vector<64x16xf32>, vector<16x8xf32>, vector<64x8xf32> -> vector<64x8xf32>
    %c1 = arith.constant 1 : index
    %c0_9 = arith.constant 0 : index
    %c0_10 = arith.constant 0 : index
    %12 = vector.load %arg4[%c1, %c0_9, %c0_10] : memref<4x64x8xf32, #tpu.memory_space<vmem>>, vector<1x64x8xf32>
    %13 = vector.shape_cast %12 : vector<1x64x8xf32> to vector<64x8xf32>
    %14 = vector.shape_cast %11 : vector<64x8xf32> to vector<1x64x8xf32>
    tpu.vector_store %arg4[%c1, %c0_9, %c0_10], %14 {strides = array<i32>} : memref<4x64x8xf32, #tpu.memory_space<vmem>>, vector<1x64x8xf32>,
    %cst_11 = arith.constant dense<0.000000e+00> : vector<64x8xf32>
    %15 = tpu.matmul %4, %5, %cst_11 {dimension_numbers = #tpu.dot_dimension_numbers<[1], [0], [0], [1], [0, 0, 1, 1], [], []>} : vector<64x16xf32>, vector<16x8xf32>, vector<64x8xf32> -> vector<64x8xf32>
    %c2 = arith.constant 2 : index
    %c0_12 = arith.constant 0 : index
    %c0_13 = arith.constant 0 : index
    %16 = vector.load %arg4[%c2, %c0_12, %c0_13] : memref<4x64x8xf32, #tpu.memory_space<vmem>>, vector<1x64x8xf32>
    %17 = vector.shape_cast %16 : vector<1x64x8xf32> to vector<64x8xf32>
    %18 = vector.shape_cast %15 : vector<64x8xf32> to vector<1x64x8xf32>
    tpu.vector_store %arg4[%c2, %c0_12, %c0_13], %18 {strides = array<i32>} : memref<4x64x8xf32, #tpu.memory_space<vmem>>, vector<1x64x8xf32>,
    %cst_14 = arith.constant dense<0.000000e+00> : vector<64x8xf32>
    %19 = tpu.matmul %4, %6, %cst_14 {dimension_numbers = #tpu.dot_dimension_numbers<[1], [0], [0], [1], [0, 0, 1, 1], [], []>} : vector<64x16xf32>, vector<16x8xf32>, vector<64x8xf32> -> vector<64x8xf32>
    %c3 = arith.constant 3 : index
    %c0_15 = arith.constant 0 : index
    %c0_16 = arith.constant 0 : index
    %20 = vector.load %arg4[%c3, %c0_15, %c0_16] : memref<4x64x8xf32, #tpu.memory_space<vmem>>, vector<1x64x8xf32>
    %21 = vector.shape_cast %20 : vector<1x64x8xf32> to vector<64x8xf32>
    %22 = vector.shape_cast %19 : vector<64x8xf32> to vector<1x64x8xf32>
    tpu.vector_store %arg4[%c3, %c0_15, %c0_16], %22 {strides = array<i32>} : memref<4x64x8xf32, #tpu.memory_space<vmem>>, vector<1x64x8xf32>,
    return
  }
  func.func @transform_0(%arg0: i32) -> (i32, i32) {
    %c0_i32 = arith.constant 0 : i32
    %c0_i32_0 = arith.constant 0 : i32
    return %arg0, %c0_i32 : i32, i32
  }
  func.func @transform_1(%arg0: i32) -> (i32, i32) {
    %c0_i32 = arith.constant 0 : i32
    %c0_i32_0 = arith.constant 0 : i32
    %c0_i32_1 = arith.constant 0 : i32
    return %c0_i32, %c0_i32_0 : i32, i32
  }
  func.func @transform_2(%arg0: i32) -> (i32, i32) {
    %c0_i32 = arith.constant 0 : i32
    %c0_i32_0 = arith.constant 0 : i32
    %c0_i32_1 = arith.constant 0 : i32
    return %c0_i32, %c0_i32_0 : i32, i32
  }
  func.func @transform_3(%arg0: i32) -> (i32, i32, i32) {
    %c0_i32 = arith.constant 0 : i32
    %c0_i32_0 = arith.constant 0 : i32
    %c0_i32_1 = arith.constant 0 : i32
    return %c0_i32, %arg0, %c0_i32_0 : i32, i32, i32
  }
}

</mosaic_0001>

<bundles_post_ra>
// kernel: harr_wav.1
= control target key start
LH: loop header
LB: loop body
LE: loop exit
PB: predicated region body
PF: predicated region fallthrough
CT: control target
= control target key end

     0   :  { %s425_s16 = smov 16   ;;  %s426_s27 = smov 112   ;;  %vm98_vm0 = vcmask 130048   ;;  %vm164_vm1 = vcmask 64512   ;;  %s707_s0 = inlined_call_operand.vmem [shape: f32[64,32], index: 0, kind: input, shape index: {}]   ;;  %s708_s1 = inlined_call_operand.vmem [shape: f32[16,8], index: 1, kind: input, shape index: {}]   ;;  %s709_s2 = inlined_call_operand.vmem [shape: f32[16,8], index: 2, kind: input, shape index: {}]   ;;  %s710_s3 = inlined_call_operand.vmem [shape: f32[4,64,8], index: 3, kind: output, shape index: {}]  }
   0x1   :  { %v450_v0 = vld [vmem:[%s707_s0] sm:$0xff]  ;;  %v455_v1 = vld [vmem:[%s707_s0 + $0x10] sm:$0xff]  ;;  %v468_v3 = vld [vmem:[%s707_s0 + $0x8] sm:$0xff] }
   0x2   :  { %62 = vrot.lane.b32.xlu0 %v450_v0, %s425_s16  ;;  %66 = vrot.lane.b32.xlu1 %v455_v1, %s425_s16  ;;  %v462_v2 = vld [vmem:[%s707_s0 + $0x20] sm:$0xff]  ;;  %v473_v4 = vld [vmem:[%s707_s0 + $0x18] sm:$0xff] }
   0x3   :  { %70 = vrot.lane.b32.xlu2 %v462_v2, %s425_s16  ;;  %v478_v5 = vld [vmem:[%s707_s0 + $0x28] sm:$0xff]  ;;  %v486_v6 = vld [vmem:[%s707_s0 + $0x30] sm:$0xff]  ;;  %v494_v7 = vld [vmem:[%s707_s0 + $0x38] sm:$0xff] }
   0x4   :  { %v95_v19 = vld [vmem:[%s708_s1 + $0x8] sm:$0xff]  ;;  %v94_v21 = vld [vmem:[%s708_s1] sm:$0xff] }
   0x5   :  { %v97_v20 = vld [vmem:[%s709_s2 + $0x8] sm:$0xff]  ;;  %277 = vmatpush.msra.mxu2 %v95_v19  ;;  %v96_v22 = vld [vmem:[%s709_s2] sm:$0xff]  ;;  %137 = vmatpush.msra.mxu0 %v95_v19 }
   0x6   :  { %327 = vmatpush.msra.mxu3 %v97_v20  ;;  %187 = vmatpush.msra.mxu1 %v97_v20 }
   0x7   :  { %278 = vmatpush.msra.mxu2 %v94_v21  ;;  %138 = vmatpush.msra.mxu0 %v94_v21 }
   0x8   :  { %328 = vmatpush.msra.mxu3 %v96_v22  ;;  %188 = vmatpush.msra.mxu1 %v96_v22 }
   0xa   :  { %64 = vrot.lane.b32.xlu0 %v468_v3, %s425_s16  ;;  %68 = vrot.lane.b32.xlu1 %v473_v4, %s425_s16 }
   0xb   :  { %72 = vrot.lane.b32.xlu2 %v478_v5, %s425_s16 }
  0x12   :  { %30 = vrot.lane.b32.xlu1 %v450_v0, %s426_s27 }
  0x13   :  { %74 = vrot.lane.b32.xlu2 %v486_v6, %s425_s16 }
  0x1a   :  { %32 = vrot.lane.b32.xlu1 %v468_v3, %s426_s27 }
  0x1b   :  { %76 = vrot.lane.b32.xlu2 %v494_v7, %s425_s16 }
  0x22   :  { %34 = vrot.lane.b32.xlu1 %v455_v1, %s426_s27 }
  0x5d   :  { %v71_v8 = vpop.permute.xlu2 %70 }
  0x5e   :  { %v90_v9 = vsub.f32 %v462_v2, %v71_v8 }
  0x60   :  { %239 = vrot.lane.b32.xlu1 %v90_v9, %s426_s27 }
  0x65   :  { %v73_v13 = vpop.permute.xlu2 %72 }
  0x66   :  { %v91_v27 = vsub.f32 %v478_v5, %v73_v13 }
  0x68   :  { %40 = vrot.lane.b32.xlu1 %v478_v5, %s426_s27 }
  0x6d   :  { %v75_v18 = vpop.permute.xlu2 %74 }
  0x6e   :  { %v92_v26 = vsub.f32 %v486_v6, %v75_v18 }
  0x74   :  { %v63_v10 = vpop.permute.xlu0 %62  ;;  %v67_v11 = vpop.permute.xlu1 %66 }
  0x75   :  { %v86_v12 = vsub.f32 %v450_v0, %v63_v10  ;;  %v88_v23 = vsub.f32 %v455_v1, %v67_v11  ;;  %v77_v24 = vpop.permute.xlu2 %76 }
  0x76   :  { %v93_v25 = vsub.f32 %v494_v7, %v77_v24 }
  0x77   :  { %231 = vrot.lane.b32.xlu0 %v86_v12, %s426_s27 }
  0x78   :  { %245 = vrot.lane.b32.xlu1 %v93_v25, %s426_s27 }
  0x7c   :  { %v65_v14 = vpop.permute.xlu0 %64  ;;  %v69_v15 = vpop.permute.xlu1 %68 }
  0x7d   :  { %v87_v16 = vsub.f32 %v468_v3, %v65_v14  ;;  %v89_v17 = vsub.f32 %v473_v4, %v69_v15 }
  0x7f   :  { %233 = vrot.lane.b32.xlu0 %v87_v16, %s426_s27  ;;  %237 = vrot.lane.b32.xlu2 %v89_v17, %s426_s27 }
  0x84   :  { %v31_v28 = vpop.permute.xlu1 %30 }
  0x85   :  { %v54_v29 = vadd.f32 %v31_v28, %v450_v0 }
  0x87   :  { %235 = vrot.lane.b32.xlu0 %v88_v23, %s426_s27  ;;  %38 = vrot.lane.b32.xlu2 %v462_v2, %s426_s27 }
  0x88   :  { %367 = vmatmul.msk.f32.vlgmr.msra.gmra.mxu0 %vm98_vm0, %v54_v29  ;;  %375 = vmatmul.msk.f32.vlgmr.msra.gmra.mxu1 %vm98_vm0, %v54_v29 }
  0x8c   :  { %v33_v30 = vpop.permute.xlu1 %32 }
  0x8d   :  { %v55_v31 = vadd.f32 %v33_v30, %v468_v3 }
  0x8f   :  { %36 = vrot.lane.b32.xlu0 %v473_v4, %s426_s27  ;;  %243 = vrot.lane.b32.xlu2 %v92_v26, %s426_s27 }
  0x90   :  { %368 = vmatmul.msk.f32.gmra.mxu0 %vm98_vm0, %v55_v31  ;;  %376 = vmatmul.msk.f32.gmra.mxu1 %vm98_vm0, %v55_v31 }
  0x94   :  { %v35_v32 = vpop.permute.xlu1 %34 }
  0x95   :  { %v56_v33 = vadd.f32 %v35_v32, %v455_v1 }
  0x97   :  { %241 = vrot.lane.b32.xlu0 %v91_v27, %s426_s27  ;;  %44 = vrot.lane.b32.xlu2 %v494_v7, %s426_s27 }
  0x98   :  { %369 = vmatmul.msk.f32.gmra.mxu0 %vm98_vm0, %v56_v33  ;;  %377 = vmatmul.msk.f32.gmra.mxu1 %vm98_vm0, %v56_v33 }
  0x9f   :  { %42 = vrot.lane.b32.xlu0 %v486_v6, %s426_s27 }
  0xd2   :  { %v240_v40 = vpop.permute.xlu1 %239 }
  0xd9   :  { %v238_v37 = vpop.permute.xlu2 %237 }
  0xda   :  { %v41_v44 = vpop.permute.xlu1 %40 }
  0xdb   :  { %v59_v45 = vadd.f32 %v41_v44, %v478_v5 }
  0xe1   :  { %v39_v41 = vpop.permute.xlu2 %38 }
  0xe2   :  { %v58_v42 = vadd.f32 %v39_v41, %v462_v2 }
  0xe9   :  { %v232_v34 = vpop.permute.xlu0 %231  ;;  %v244_v46 = vpop.permute.xlu2 %243 }
  0xea   :  { %391 = vmatmul.msk.f32.vlgmr.msra.gmra.mxu2 %vm98_vm0, %v232_v34  ;;  %407 = vmatmul.msk.f32.vlgmr.msra.gmra.mxu3 %vm98_vm0, %v232_v34  ;;  %v246_v50 = vpop.permute.xlu1 %245 }
  0xf1   :  { %v234_v35 = vpop.permute.xlu0 %233  ;;  %v45_v49 = vpop.permute.xlu2 %44 }
  0xf2   :  { %392 = vmatmul.msk.f32.gmra.mxu2 %vm98_vm0, %v234_v35  ;;  %408 = vmatmul.msk.f32.gmra.mxu3 %vm98_vm0, %v234_v35  ;;  %v61_v51 = vadd.f32 %v45_v49, %v494_v7 }
  0xf9   :  { %v236_v36 = vpop.permute.xlu0 %235 }
  0xfa   :  { %393 = vmatmul.msk.f32.gmra.mxu2 %vm98_vm0, %v236_v36  ;;  %409 = vmatmul.msk.f32.gmra.mxu3 %vm98_vm0, %v236_v36 }
 0x101   :  { %v37_v38 = vpop.permute.xlu0 %36 }
 0x102   :  { %394 = vmatmul.msk.f32.gmra.mxu2 %vm98_vm0, %v238_v37  ;;  %410 = vmatmul.msk.f32.gmra.mxu3 %vm98_vm0, %v238_v37  ;;  %v57_v39 = vadd.f32 %v37_v38, %v473_v4 }
 0x104   :  { %370 = vmatmul.msk.f32.gmra.mxu0 %vm98_vm0, %v57_v39  ;;  %378 = vmatmul.msk.f32.gmra.mxu1 %vm98_vm0, %v57_v39 }
 0x105   :  { %v140_v52 = vpop.f32.mrf.mxu0  ;;  %v190_v53 = vpop.f32.mrf.mxu1 }
 0x106   :  { %165 = vst.msk [vmem:[%s710_s3] sm:$0xff] %vm164_vm1, %v140_v52 }
 0x107   :  { %383 = vst.msk [vmem:[%s710_s3 + $0x40] sm:$0xff] %vm164_vm1, %v190_v53 }
 0x109   :  { %v242_v43 = vpop.permute.xlu0 %241 }
 0x10a   :  { %395 = vmatmul.msk.f32.gmra.mxu2 %vm98_vm0, %v240_v40  ;;  %411 = vmatmul.msk.f32.gmra.mxu3 %vm98_vm0, %v240_v40 }
 0x10c   :  { %371 = vmatmul.msk.f32.gmra.mxu0 %vm98_vm0, %v58_v42  ;;  %379 = vmatmul.msk.f32.gmra.mxu1 %vm98_vm0, %v58_v42 }
 0x10d   :  { %v143_v54 = vpop.f32.mrf.mxu0  ;;  %v193_v55 = vpop.f32.mrf.mxu1 }
 0x10e   :  { %166 = vst.msk [vmem:[%s710_s3 + $0x8] sm:$0xff] %vm164_vm1, %v143_v54 }
 0x10f   :  { %384 = vst.msk [vmem:[%s710_s3 + $0x48] sm:$0xff] %vm164_vm1, %v193_v55 }
 0x111   :  { %v43_v47 = vpop.permute.xlu0 %42 }
 0x112   :  { %396 = vmatmul.msk.f32.gmra.mxu2 %vm98_vm0, %v242_v43  ;;  %412 = vmatmul.msk.f32.gmra.mxu3 %vm98_vm0, %v242_v43  ;;  %v60_v48 = vadd.f32 %v43_v47, %v486_v6 }
 0x114   :  { %372 = vmatmul.msk.f32.gmra.mxu0 %vm98_vm0, %v59_v45  ;;  %380 = vmatmul.msk.f32.gmra.mxu1 %vm98_vm0, %v59_v45 }
 0x115   :  { %v146_v56 = vpop.f32.mrf.mxu0  ;;  %v196_v57 = vpop.f32.mrf.mxu1 }
 0x116   :  { %167 = vst.msk [vmem:[%s710_s3 + $0x10] sm:$0xff] %vm164_vm1, %v146_v56 }
 0x117   :  { %385 = vst.msk [vmem:[%s710_s3 + $0x50] sm:$0xff] %vm164_vm1, %v196_v57 }
 0x11a   :  { %397 = vmatmul.msk.f32.gmra.mxu2 %vm98_vm0, %v244_v46  ;;  %413 = vmatmul.msk.f32.gmra.mxu3 %vm98_vm0, %v244_v46 }
 0x11c   :  { %373 = vmatmul.msk.f32.gmra.mxu0 %vm98_vm0, %v60_v48  ;;  %381 = vmatmul.msk.f32.gmra.mxu1 %vm98_vm0, %v60_v48 }
 0x122   :  { %398 = vmatmul.msk.f32.gmra.mxu2 %vm98_vm0, %v246_v50  ;;  %414 = vmatmul.msk.f32.gmra.mxu3 %vm98_vm0, %v246_v50 }
 0x124   :  { %374 = vmatmul.msk.f32.gmra.mxu0 %vm98_vm0, %v61_v51  ;;  %382 = vmatmul.msk.f32.gmra.mxu1 %vm98_vm0, %v61_v51 }
 0x16d   :  { %v280_v58 = vpop.f32.mrf.mxu2  ;;  %v330_v59 = vpop.f32.mrf.mxu3 }
 0x16e   :  { %399 = vst.msk [vmem:[%s710_s3 + $0x80] sm:$0xff] %vm164_vm1, %v280_v58 }
 0x16f   :  { %415 = vst.msk [vmem:[%s710_s3 + $0xc0] sm:$0xff] %vm164_vm1, %v330_v59 }
 0x175   :  { %v283_v60 = vpop.f32.mrf.mxu2  ;;  %v333_v61 = vpop.f32.mrf.mxu3 }
 0x176   :  { %400 = vst.msk [vmem:[%s710_s3 + $0x88] sm:$0xff] %vm164_vm1, %v283_v60 }
 0x177   :  { %416 = vst.msk [vmem:[%s710_s3 + $0xc8] sm:$0xff] %vm164_vm1, %v333_v61 }
 0x17d   :  { %v286_v62 = vpop.f32.mrf.mxu2  ;;  %v336_v63 = vpop.f32.mrf.mxu3 }
 0x17e   :  { %401 = vst.msk [vmem:[%s710_s3 + $0x90] sm:$0xff] %vm164_vm1, %v286_v62 }
 0x17f   :  { %417 = vst.msk [vmem:[%s710_s3 + $0xd0] sm:$0xff] %vm164_vm1, %v336_v63 }
 0x181   :  { %v149_v0 = vpop.f32.mrf.mxu0  ;;  %v199_v1 = vpop.f32.mrf.mxu1 }
 0x182   :  { %168 = vst.msk [vmem:[%s710_s3 + $0x18] sm:$0xff] %vm164_vm1, %v149_v0 }
 0x183   :  { %386 = vst.msk [vmem:[%s710_s3 + $0x58] sm:$0xff] %vm164_vm1, %v199_v1 }
 0x185   :  { %v289_v2 = vpop.f32.mrf.mxu2  ;;  %v339_v3 = vpop.f32.mrf.mxu3 }
 0x186   :  { %402 = vst.msk [vmem:[%s710_s3 + $0x98] sm:$0xff] %vm164_vm1, %v289_v2 }
 0x187   :  { %418 = vst.msk [vmem:[%s710_s3 + $0xd8] sm:$0xff] %vm164_vm1, %v339_v3 }
 0x189   :  { %v152_v4 = vpop.f32.mrf.mxu0  ;;  %v202_v5 = vpop.f32.mrf.mxu1 }
 0x18a   :  { %169 = vst.msk [vmem:[%s710_s3 + $0x20] sm:$0xff] %vm164_vm1, %v152_v4 }
 0x18b   :  { %387 = vst.msk [vmem:[%s710_s3 + $0x60] sm:$0xff] %vm164_vm1, %v202_v5 }
 0x18d   :  { %v292_v6 = vpop.f32.mrf.mxu2  ;;  %v342_v7 = vpop.f32.mrf.mxu3 }
 0x18e   :  { %403 = vst.msk [vmem:[%s710_s3 + $0xa0] sm:$0xff] %vm164_vm1, %v292_v6 }
 0x18f   :  { %419 = vst.msk [vmem:[%s710_s3 + $0xe0] sm:$0xff] %vm164_vm1, %v342_v7 }
 0x191   :  { %v155_v8 = vpop.f32.mrf.mxu0  ;;  %v205_v9 = vpop.f32.mrf.mxu1 }
 0x192   :  { %170 = vst.msk [vmem:[%s710_s3 + $0x28] sm:$0xff] %vm164_vm1, %v155_v8 }
 0x193   :  { %388 = vst.msk [vmem:[%s710_s3 + $0x68] sm:$0xff] %vm164_vm1, %v205_v9 }
 0x195   :  { %v295_v10 = vpop.f32.mrf.mxu2  ;;  %v345_v11 = vpop.f32.mrf.mxu3 }
 0x196   :  { %404 = vst.msk [vmem:[%s710_s3 + $0xa8] sm:$0xff] %vm164_vm1, %v295_v10 }
 0x197   :  { %420 = vst.msk [vmem:[%s710_s3 + $0xe8] sm:$0xff] %vm164_vm1, %v345_v11 }
 0x199   :  { %v158_v12 = vpop.f32.mrf.mxu0  ;;  %v208_v13 = vpop.f32.mrf.mxu1 }
 0x19a   :  { %171 = vst.msk [vmem:[%s710_s3 + $0x30] sm:$0xff] %vm164_vm1, %v158_v12 }
 0x19b   :  { %389 = vst.msk [vmem:[%s710_s3 + $0x70] sm:$0xff] %vm164_vm1, %v208_v13 }
 0x19d   :  { %v298_v14 = vpop.f32.mrf.mxu2  ;;  %v348_v15 = vpop.f32.mrf.mxu3 }
 0x19e   :  { %405 = vst.msk [vmem:[%s710_s3 + $0xb0] sm:$0xff] %vm164_vm1, %v298_v14 }
 0x19f   :  { %421 = vst.msk [vmem:[%s710_s3 + $0xf0] sm:$0xff] %vm164_vm1, %v348_v15 }
 0x1a1   :  { %v161_v16 = vpop.f32.mrf.mxu0  ;;  %v211_v17 = vpop.f32.mrf.mxu1 }
 0x1a2   :  { %172 = vst.msk [vmem:[%s710_s3 + $0x38] sm:$0xff] %vm164_vm1, %v161_v16 }
 0x1a3   :  { %390 = vst.msk [vmem:[%s710_s3 + $0x78] sm:$0xff] %vm164_vm1, %v211_v17 }
 0x1a5   :  { %v301_v18 = vpop.f32.mrf.mxu2  ;;  %v351_v19 = vpop.f32.mrf.mxu3 }
 0x1a6   :  { %406 = vst.msk [vmem:[%s710_s3 + $0xb8] sm:$0xff] %vm164_vm1, %v301_v18 }
 0x1a7   :  { %422 = vst.msk [vmem:[%s710_s3 + $0xf8] sm:$0xff] %vm164_vm1, %v351_v19 }

</bundles_post_ra>
